<compile_context>
chip_gen: v6e
topology: v6e:2x2x1
jax: 0.10.0
libtpu: 0.0.40
codegen_flags: <defaults>
</compile_context>

<pallas_src>
import functools

import jax
import jax.numpy as jnp
import numpy as np
from jax import lax
from jax.experimental import pallas as pl
from jax.experimental.pallas import tpu as pltpu


def _pick_channel_tile(C, HW, itemsize=4, budget_bytes=8 * 1024 * 1024):
    """Largest channel tile whose (Ct, HW) f32 block fits the VMEM budget."""
    if C * HW * itemsize <= budget_bytes:
        return C
    if C % 128 != 0:
        return C  # keep it simple for odd channel counts
    groups = C // 128
    max_groups = max(1, budget_bytes // (128 * HW * itemsize))
    best = 1
    for g in range(1, groups + 1):
        if groups % g == 0 and g <= max_groups:
            best = g
    return best * 128


def _conv_stats_kernel(w_ref, x_ref, mask_ref, y_ref, stats_ref, *, W, HW):
    # w_ref:    VMEM (9, Ct)     conv weight, tap-major [k, c]
    # x_ref:    VMEM (1, Ct, HW) channel tile of this batch element
    # mask_ref: VMEM (9, HW)     per-tap source-side boundary masks (0/1)
    # y_ref:    VMEM (1, 1, HW)  conv output (accumulated across channel tiles)
    # stats_ref:VMEM (1, 1, 2)   [sum(y), sum((y - mean_n)^2)] for this batch
    ct = pl.program_id(1)
    last = pl.num_programs(1) - 1

    # Channel contraction on the MXU: one matmul produces all 9 tap images.
    taps = jnp.dot(w_ref[...], x_ref[0],
                   preferred_element_type=jnp.float32)          # (9, HW)
    taps = taps * mask_ref[...]                                  # zero the halo

    acc = jnp.zeros((1, HW), jnp.float32)
    for k in range(9):
        dy, dx = k // 3 - 1, k % 3 - 1
        s = dy * W + dx                                          # flat shift
        t = taps[k:k + 1, :]
        if s != 0:
            # shifted[p] = t[(p + s) % HW]; wrapped lanes were pre-masked to 0
            t = pltpu.roll(t, shift=(-s) % HW, axis=1)
        acc = acc + t

    @pl.when(ct == 0)
    def _():
        y_ref[0] = acc

    @pl.when(ct != 0)
    def _():
        y_ref[0] = y_ref[0] + acc

    @pl.when(ct == last)
    def _():
        y = y_ref[0]                                             # (1, HW)
        total = jnp.sum(y)
        mean_n = total * (1.0 / HW)
        m2 = jnp.sum((y - mean_n) * (y - mean_n))
        stats_ref[...] = jnp.concatenate(
            [total.reshape(1, 1), m2.reshape(1, 1)], axis=-1).reshape(1, 1, 2)


def _bn_pool_kernel(bn_ref, y_ref, x_ref, ccam_ref, fg_ref, bg_ref,
                    *, HW, apply_sigmoid):
    # bn_ref:  SMEM (4,)        [mean, var, gamma, beta]
    # y_ref:   VMEM (1, 1, HW)  conv output of this batch element
    # x_ref:   VMEM (1, Ct, HW) channel tile of the original input
    # ccam_ref:VMEM (1, 1, HW)
    # fg_ref / bg_ref: VMEM (1, 1, Ct)
    ct = pl.program_id(1)
    mean = bn_ref[0]
    var = bn_ref[1]
    gamma = bn_ref[2]
    beta = bn_ref[3]
    inv_std = lax.rsqrt(var + 1e-5)

    yn = (y_ref[0] - mean) * (inv_std * gamma) + beta            # (1, HW)
    ccam = jax.nn.sigmoid(yn) if apply_sigmoid else yn

    @pl.when(ct == 0)
    def _():
        ccam_ref[0] = ccam

    # Pooling on the MXU: [ccam ; ones] (2, HW) contracted with x (Ct, HW)
    # over HW -> (2, Ct).  Row 0 -> fg * HW, row 1 -> per-channel sum of x.
    w2 = jnp.concatenate([ccam, jnp.ones_like(ccam)], axis=0)    # (2, HW)
    res = lax.dot_general(w2, x_ref[0],
                          dimension_numbers=(((1,), (1,)), ((), ())),
                          preferred_element_type=jnp.float32)    # (2, Ct)
    inv_hw = 1.0 / HW
    fg = res[0:1, :] * inv_hw
    bg = res[1:2, :] * inv_hw - fg                               # mean(x) - fg
    fg_ref[0] = fg
    bg_ref[0] = bg


def disentangler_forward(x, conv_w, gamma=1.0, beta=0.0, inference=False):
    """x: (N, C, H, W) f32, conv_w: (1, C, 3, 3) f32. Returns (fg, bg, ccam)."""
    N, C, H, W = x.shape
    HW = H * W
    x = x.astype(jnp.float32)
    x_flat = x.reshape(N, C, HW)                                 # lane-dense
    w_taps = jnp.transpose(conv_w.astype(jnp.float32).reshape(C, 9))  # (9, C)

    # Per-tap boundary masks, applied on the *source* side (mask rolled by +s)
    # so the kernel only needs one (9, HW) multiply before the 9 rolls.
    ii = np.arange(HW)
    rows, cols = ii // W, ii % W
    masks = np.empty((9, HW), np.float32)
    for k in range(9):
        dy, dx = k // 3 - 1, k % 3 - 1
        valid = ((rows + dy >= 0) & (rows + dy < H) &
                 (cols + dx >= 0) & (cols + dx < W)).astype(np.float32)
        masks[k] = np.roll(valid, dy * W + dx)
    masks = jnp.asarray(masks)

    Ct = _pick_channel_tile(C, HW)
    n_ct = C // Ct

    y_conv, stats = pl.pallas_call(
        functools.partial(_conv_stats_kernel, W=W, HW=HW),
        grid=(N, n_ct),
        in_specs=[
            pl.BlockSpec((9, Ct), lambda n, c: (0, c)),
            pl.BlockSpec((1, Ct, HW), lambda n, c: (n, c, 0)),
            pl.BlockSpec((9, HW), lambda n, c: (0, 0)),
        ],
        out_specs=[
            pl.BlockSpec((1, 1, HW), lambda n, c: (n, 0, 0)),
            pl.BlockSpec((1, 1, 2), lambda n, c: (n, 0, 0)),
        ],
        out_shape=[
            jax.ShapeDtypeStruct((N, 1, HW), jnp.float32),
            jax.ShapeDtypeStruct((N, 1, 2), jnp.float32),
        ],
        compiler_params=pltpu.CompilerParams(
            dimension_semantics=("parallel", "arbitrary")),
    )(w_taps, x_flat, masks)

    # BatchNorm2d(1) training-mode batch statistics over (N, H, W), combined
    # from per-batch partial sums with Chan's parallel-variance formula
    # (numerically safe, biased variance as PyTorch uses for normalization).
    # TODO(synk): eval-mode BatchNorm would use running_mean/running_var; this
    # always uses batch statistics (module kept in .train()).
    count = float(N * HW)
    sums = stats[:, 0, 0]                                        # (N,)
    m2s = stats[:, 0, 1]                                         # (N,)
    mean = jnp.sum(sums) / count
    mean_n = sums / float(HW)
    m2 = jnp.sum(m2s) + float(HW) * jnp.sum((mean_n - mean) ** 2)
    var = m2 / count
    bn_params = jnp.stack(
        [mean, var, jnp.float32(gamma), jnp.float32(beta)]).astype(jnp.float32)

    ccam, fg, bg = pl.pallas_call(
        functools.partial(_bn_pool_kernel, HW=HW,
                          apply_sigmoid=not inference),
        grid=(N, n_ct),
        in_specs=[
            pl.BlockSpec(memory_space=pltpu.MemorySpace.SMEM),
            pl.BlockSpec((1, 1, HW), lambda n, c: (n, 0, 0)),
            pl.BlockSpec((1, Ct, HW), lambda n, c: (n, c, 0)),
        ],
        out_specs=[
            pl.BlockSpec((1, 1, HW), lambda n, c: (n, 0, 0)),
            pl.BlockSpec((1, 1, Ct), lambda n, c: (n, 0, c)),
            pl.BlockSpec((1, 1, Ct), lambda n, c: (n, 0, c)),
        ],
        out_shape=[
            jax.ShapeDtypeStruct((N, 1, HW), jnp.float32),
            jax.ShapeDtypeStruct((N, 1, C), jnp.float32),
            jax.ShapeDtypeStruct((N, 1, C), jnp.float32),
        ],
        compiler_params=pltpu.CompilerParams(
            dimension_semantics=("parallel", "arbitrary")),
    )(bn_params, y_conv, x_flat)

    return fg.reshape(N, C), bg.reshape(N, C), ccam.reshape(N, 1, H, W)


def _reference(x, conv_w, gamma, beta):
    N, C, H, W = x.shape
    y = lax.conv_general_dilated(
        x, conv_w, (1, 1), "SAME",
        dimension_numbers=("NCHW", "OIHW", "NCHW"),
        precision=lax.Precision.HIGHEST)                         # (N, 1, H, W)
    mean = jnp.mean(y)
    var = jnp.mean((y - mean) ** 2)
    ccam = jax.nn.sigmoid((y - mean) / jnp.sqrt(var + 1e-5) * gamma + beta)
    ccam_ = ccam.reshape(N, 1, H * W)
    xr = x.reshape(N, C, H * W).transpose(0, 2, 1)
    fg = jnp.matmul(ccam_, xr, precision=lax.Precision.HIGHEST) / (H * W)
    bg = jnp.matmul(1.0 - ccam_, xr, precision=lax.Precision.HIGHEST) / (H * W)
    return fg.reshape(N, -1), bg.reshape(N, -1), ccam


if __name__ == "__main__":
    key = jax.random.PRNGKey(0)
    k1, k2 = jax.random.split(key)
    N, C, H, W = 2, 4, 16, 16

    x = jax.random.normal(k1, (N, C, H, W), jnp.float32)
    conv_w = jax.random.normal(k2, (1, C, 3, 3), jnp.float32) * 0.1  # Conv2d weight
    gamma, beta = 1.0, 0.0                                           # BN defaults

    fg, bg, ccam = disentangler_forward(x, conv_w, gamma, beta, inference=False)
    jax.block_until_ready((fg, bg, ccam))

    fg_r, bg_r, ccam_r = _reference(x, conv_w, gamma, beta)
    # Tolerance allows for MXU contraction precision (bf16-pass decomposition
    # of f32 matmuls) vs. the HIGHEST-precision XLA reference.
    np.testing.assert_allclose(np.asarray(ccam), np.asarray(ccam_r), rtol=2e-3, atol=2e-3)
    np.testing.assert_allclose(np.asarray(fg), np.asarray(fg_r), rtol=2e-3, atol=2e-3)
    np.testing.assert_allclose(np.asarray(bg), np.asarray(bg_r), rtol=2e-3, atol=2e-3)

    print("KERNEL_OK")
</pallas_src>

<mosaic_0001>
module attributes {stable_mosaic.version = 11 : i64} {
  func.func @_conv_stats_kernel(%arg0: i32, %arg1: i32, %arg2: memref<9x4xf32, #tpu.memory_space<vmem>>, %arg3: memref<1x4x256xf32, #tpu.memory_space<vmem>>, %arg4: memref<9x256xf32, #tpu.memory_space<vmem>>, %arg5: memref<1x1x256xf32, #tpu.memory_space<vmem>>, %arg6: memref<1x1x2xf32, #tpu.memory_space<vmem>>) attributes {dimension_semantics = [#tpu.dimension_semantics<parallel>, #tpu.dimension_semantics<arbitrary>], iteration_bounds = array<i64: 2, 1>, scalar_prefetch = 0 : i64, scratch_operands = 0 : i64, tpu.core_type = #tpu.core_type<tc>, window_params = [{transform_indices = @transform_0, window_bounds = array<i64: 9, 4>}, {transform_indices = @transform_1, window_bounds = array<i64: 1, 4, 256>}, {pipeline_mode = #tpu.pipeline_mode<synchronous>, transform_indices = @transform_2, window_bounds = array<i64: 9, 256>}, {transform_indices = @transform_3, window_bounds = array<i64: 1, 1, 256>}, {transform_indices = @transform_4, window_bounds = array<i64: 1, 1, 2>}]} {
    %c0 = arith.constant 0 : index
    %c0_0 = arith.constant 0 : index
    %0 = vector.load %arg2[%c0, %c0_0] : memref<9x4xf32, #tpu.memory_space<vmem>>, vector<9x4xf32>
    %c0_1 = arith.constant 0 : index
    %c0_2 = arith.constant 0 : index
    %c0_3 = arith.constant 0 : index
    %1 = vector.load %arg3[%c0_1, %c0_2, %c0_3] : memref<1x4x256xf32, #tpu.memory_space<vmem>>, vector<1x4x256xf32>
    %2 = vector.shape_cast %1 : vector<1x4x256xf32> to vector<4x256xf32>
    %cst = arith.constant dense<0.000000e+00> : vector<9x256xf32>
    %3 = tpu.matmul %0, %2, %cst {dimension_numbers = #tpu.dot_dimension_numbers<[1], [0], [0], [1], [0, 0, 1, 1], [], []>} : vector<9x4xf32>, vector<4x256xf32>, vector<9x256xf32> -> vector<9x256xf32>
    %c0_4 = arith.constant 0 : index
    %c0_5 = arith.constant 0 : index
    %4 = vector.load %arg4[%c0_4, %c0_5] : memref<9x256xf32, #tpu.memory_space<vmem>>, vector<9x256xf32>
    %5 = arith.mulf %3, %4 : vector<9x256xf32>
    %cst_6 = arith.constant 0.000000e+00 : f32
    %6 = vector.broadcast %cst_6 : f32 to vector<1x256xf32>
    %7 = vector.extract_strided_slice %5 {offsets = [0, 0], sizes = [1, 256], strides = [1, 1]} : vector<9x256xf32> to vector<1x256xf32>
    %c17_i32 = arith.constant 17 : i32
    %8 = tpu.dynamic_rotate %7 by %c17_i32 dim 1 : vector<1x256xf32>, i32 -> vector<1x256xf32>
    %9 = arith.addf %6, %8 : vector<1x256xf32>
    %10 = vector.extract_strided_slice %5 {offsets = [1, 0], sizes = [1, 256], strides = [1, 1]} : vector<9x256xf32> to vector<1x256xf32>
    %c16_i32 = arith.constant 16 : i32
    %11 = tpu.dynamic_rotate %10 by %c16_i32 dim 1 : vector<1x256xf32>, i32 -> vector<1x256xf32>
    %12 = arith.addf %9, %11 : vector<1x256xf32>
    %13 = vector.extract_strided_slice %5 {offsets = [2, 0], sizes = [1, 256], strides = [1, 1]} : vector<9x256xf32> to vector<1x256xf32>
    %c15_i32 = arith.constant 15 : i32
    %14 = tpu.dynamic_rotate %13 by %c15_i32 dim 1 : vector<1x256xf32>, i32 -> vector<1x256xf32>
    %15 = arith.addf %12, %14 : vector<1x256xf32>
    %16 = vector.extract_strided_slice %5 {offsets = [3, 0], sizes = [1, 256], strides = [1, 1]} : vector<9x256xf32> to vector<1x256xf32>
    %c1_i32 = arith.constant 1 : i32
    %17 = tpu.dynamic_rotate %16 by %c1_i32 dim 1 : vector<1x256xf32>, i32 -> vector<1x256xf32>
    %18 = arith.addf %15, %17 : vector<1x256xf32>
    %19 = vector.extract_strided_slice %5 {offsets = [4, 0], sizes = [1, 256], strides = [1, 1]} : vector<9x256xf32> to vector<1x256xf32>
    %20 = arith.addf %18, %19 : vector<1x256xf32>
    %21 = vector.extract_strided_slice %5 {offsets = [5, 0], sizes = [1, 256], strides = [1, 1]} : vector<9x256xf32> to vector<1x256xf32>
    %c255_i32 = arith.constant 255 : i32
    %22 = tpu.dynamic_rotate %21 by %c255_i32 dim 1 : vector<1x256xf32>, i32 -> vector<1x256xf32>
    %23 = arith.addf %20, %22 : vector<1x256xf32>
    %24 = vector.extract_strided_slice %5 {offsets = [6, 0], sizes = [1, 256], strides = [1, 1]} : vector<9x256xf32> to vector<1x256xf32>
    %c241_i32 = arith.constant 241 : i32
    %25 = tpu.dynamic_rotate %24 by %c241_i32 dim 1 : vector<1x256xf32>, i32 -> vector<1x256xf32>
    %26 = arith.addf %23, %25 : vector<1x256xf32>
    %27 = vector.extract_strided_slice %5 {offsets = [7, 0], sizes = [1, 256], strides = [1, 1]} : vector<9x256xf32> to vector<1x256xf32>
    %c240_i32 = arith.constant 240 : i32
    %28 = tpu.dynamic_rotate %27 by %c240_i32 dim 1 : vector<1x256xf32>, i32 -> vector<1x256xf32>
    %29 = arith.addf %26, %28 : vector<1x256xf32>
    %30 = vector.extract_strided_slice %5 {offsets = [8, 0], sizes = [1, 256], strides = [1, 1]} : vector<9x256xf32> to vector<1x256xf32>
    %c239_i32 = arith.constant 239 : i32
    %31 = tpu.dynamic_rotate %30 by %c239_i32 dim 1 : vector<1x256xf32>, i32 -> vector<1x256xf32>
    %32 = arith.addf %29, %31 : vector<1x256xf32>
    %c0_i32 = arith.constant 0 : i32
    %33 = arith.cmpi eq, %arg1, %c0_i32 : i32
    %34 = arith.extui %33 : i1 to i32
    %c0_i32_7 = arith.constant 0 : i32
    %35 = arith.cmpi ne, %34, %c0_i32_7 : i32
    scf.if %35 {
      %c0_12 = arith.constant 0 : index
      %c0_13 = arith.constant 0 : index
      %c0_14 = arith.constant 0 : index
      %42 = vector.load %arg5[%c0_12, %c0_13, %c0_14] : memref<1x1x256xf32, #tpu.memory_space<vmem>>, vector<1x1x256xf32>
      %43 = vector.shape_cast %42 : vector<1x1x256xf32> to vector<1x256xf32>
      %44 = vector.shape_cast %32 : vector<1x256xf32> to vector<1x1x256xf32>
      tpu.vector_store %arg5[%c0_12, %c0_13, %c0_14], %44 {strides = array<i32>} : memref<1x1x256xf32, #tpu.memory_space<vmem>>, vector<1x1x256xf32>,
    } else {
    }
    %c0_i32_8 = arith.constant 0 : i32
    %36 = arith.cmpi ne, %arg1, %c0_i32_8 : i32
    %37 = arith.extui %36 : i1 to i32
    %c0_i32_9 = arith.constant 0 : i32
    %38 = arith.cmpi ne, %37, %c0_i32_9 : i32
    scf.if %38 {
      %c0_12 = arith.constant 0 : index
      %c0_13 = arith.constant 0 : index
      %c0_14 = arith.constant 0 : index
      %42 = vector.load %arg5[%c0_12, %c0_13, %c0_14] : memref<1x1x256xf32, #tpu.memory_space<vmem>>, vector<1x1x256xf32>
      %43 = vector.shape_cast %42 : vector<1x1x256xf32> to vector<1x256xf32>
      %44 = arith.addf %43, %32 : vector<1x256xf32>
      %c0_15 = arith.constant 0 : index
      %c0_16 = arith.constant 0 : index
      %c0_17 = arith.constant 0 : index
      %45 = vector.load %arg5[%c0_15, %c0_16, %c0_17] : memref<1x1x256xf32, #tpu.memory_space<vmem>>, vector<1x1x256xf32>
      %46 = vector.shape_cast %45 : vector<1x1x256xf32> to vector<1x256xf32>
      %47 = vector.shape_cast %44 : vector<1x256xf32> to vector<1x1x256xf32>
      tpu.vector_store %arg5[%c0_15, %c0_16, %c0_17], %47 {strides = array<i32>} : memref<1x1x256xf32, #tpu.memory_space<vmem>>, vector<1x1x256xf32>,
    } else {
    }
    %c0_i32_10 = arith.constant 0 : i32
    %39 = arith.cmpi eq, %arg1, %c0_i32_10 : i32
    %40 = arith.extui %39 : i1 to i32
    %c0_i32_11 = arith.constant 0 : i32
    %41 = arith.cmpi ne, %40, %c0_i32_11 : i32
    scf.if %41 {
      %c0_12 = arith.constant 0 : index
      %c0_13 = arith.constant 0 : index
      %c0_14 = arith.constant 0 : index
      %42 = vector.load %arg5[%c0_12, %c0_13, %c0_14] : memref<1x1x256xf32, #tpu.memory_space<vmem>>, vector<1x1x256xf32>
      %43 = vector.shape_cast %42 : vector<1x1x256xf32> to vector<1x256xf32>
      %44 = vector.shape_cast %43 : vector<1x256xf32> to vector<1x1x256xf32>
      %cst_15 = arith.constant dense<0.000000e+00> : vector<1xf32>
      %45 = vector.multi_reduction <add>, %44, %cst_15 [1, 2] : vector<1x1x256xf32> to vector<1xf32>
      %46 = vector.shape_cast %45 : vector<1xf32> to vector<1x1x1xf32>
      %47 = vector.extract %46[0, 0, 0] : f32 from vector<1x1x1xf32>
      %cst_16 = arith.constant 3.906250e-03 : f32
      %48 = arith.mulf %47, %cst_16 : f32
      %49 = vector.broadcast %48 : f32 to vector<1x256xf32>
      %50 = arith.subf %43, %49 : vector<1x256xf32>
      %51 = vector.broadcast %48 : f32 to vector<1x256xf32>
      %52 = arith.subf %43, %51 : vector<1x256xf32>
      %53 = arith.mulf %50, %52 : vector<1x256xf32>
      %54 = vector.shape_cast %53 : vector<1x256xf32> to vector<1x1x256xf32>
      %cst_17 = arith.constant dense<0.000000e+00> : vector<1xf32>
      %55 = vector.multi_reduction <add>, %54, %cst_17 [1, 2] : vector<1x1x256xf32> to vector<1xf32>
      %56 = vector.shape_cast %55 : vector<1xf32> to vector<1x1x1xf32>
      %57 = vector.extract %56[0, 0, 0] : f32 from vector<1x1x1xf32>
      %58 = vector.broadcast %47 : f32 to vector<1x1xf32>
      %59 = vector.broadcast %57 : f32 to vector<1x1xf32>
      %60 = tpu.concatenate %58, %59 in 1 : vector<1x1xf32>, vector<1x1xf32> -> vector<1x2xf32>
      %61 = vector.shape_cast %60 : vector<1x2xf32> to vector<1x1x2xf32>
      %c0_18 = arith.constant 0 : index
      %c0_19 = arith.constant 0 : index
      %c0_20 = arith.constant 0 : index
      %62 = vector.load %arg6[%c0_18, %c0_19, %c0_20] : memref<1x1x2xf32, #tpu.memory_space<vmem>>, vector<1x1x2xf32>
      tpu.vector_store %arg6[%c0_18, %c0_19, %c0_20], %61 {strides = array<i32>} : memref<1x1x2xf32, #tpu.memory_space<vmem>>, vector<1x1x2xf32>,
    } else {
    }
    return
  }
  func.func @transform_0(%arg0: i32, %arg1: i32) -> (i32, i32) {
    %c0_i32 = arith.constant 0 : i32
    %c0_i32_0 = arith.constant 0 : i32
    return %c0_i32, %arg1 : i32, i32
  }
  func.func @transform_1(%arg0: i32, %arg1: i32) -> (i32, i32, i32) {
    %c0_i32 = arith.constant 0 : i32
    %c0_i32_0 = arith.constant 0 : i32
    return %arg0, %arg1, %c0_i32 : i32, i32, i32
  }
  func.func @transform_2(%arg0: i32, %arg1: i32) -> (i32, i32) {
    %c0_i32 = arith.constant 0 : i32
    %c0_i32_0 = arith.constant 0 : i32
    %c0_i32_1 = arith.constant 0 : i32
    return %c0_i32, %c0_i32_0 : i32, i32
  }
  func.func @transform_3(%arg0: i32, %arg1: i32) -> (i32, i32, i32) {
    %c0_i32 = arith.constant 0 : i32
    %c0_i32_0 = arith.constant 0 : i32
    %c0_i32_1 = arith.constant 0 : i32
    return %arg0, %c0_i32, %c0_i32_0 : i32, i32, i32
  }
  func.func @transform_4(%arg0: i32, %arg1: i32) -> (i32, i32, i32) {
    %c0_i32 = arith.constant 0 : i32
    %c0_i32_0 = arith.constant 0 : i32
    %c0_i32_1 = arith.constant 0 : i32
    return %arg0, %c0_i32, %c0_i32_0 : i32, i32, i32
  }
}

</mosaic_0001>

<bundles_post_ra>
// kernel: tpu_custom_call.1
= control target key start
LH: loop header
LB: loop body
LE: loop exit
PB: predicated region body
PF: predicated region fallthrough
CT: control target
= control target key end

     0   :  { %10 = vsyncpa [#allocation3], 0  ;;  %s1233_s0 = inlined_call_operand.vmem [shape: f32[9,4], index: 0, kind: input, shape index: {}]   ;;  %s1234_s1 = inlined_call_operand.vmem [shape: f32[2,4,256], index: 1, kind: input, shape index: {}]   ;;  %s1235_s2 = inlined_call_operand.hbm [shape: f32[9,256], index: 2, kind: input, shape index: {}]   ;;  %s1236_s3 = inlined_call_operand.hbm [shape: f32[2,1,256], index: 3, kind: output, shape index: {0}]   ;;  %s1237_s4 = inlined_call_operand.hbm [shape: f32[2,1,2], index: 4, kind: output, shape index: {1}]  }
   0x1   :  { %11 = vsyncpa [#allocation4], 0 }
   0x2   :  { %13 = vsyncpa [#allocation4 + $0x1], 0 }
   0x3   :  { %14 = vsyncpa [#allocation7], 0 }
   0x4   :  { %16 = vsyncpa [#allocation7 + $0x1], 0  ;;  %s1043_s15 = smov 0   ;;  %s1045_s16 = smov 0  }
   0x5   :  { %s1047_s17 = smov 0   ;;  %s1049_s18 = smov 0  }
   0x6   :  { %s1051_s19 = smov 0   ;;  %s1053_s20 = smov 0  }
   0x7 LB: > { %s752_s21 = sadd.s32 4294967295, %s1001_s20   ;;  %s753_s22 = sadd.s32 4294967294, %s1001_s20   ;;  %s1001_s20 = sphi %s1053_s20, %s22_s20   ;;  %s997_s19 = sphi %s1051_s19, %s1246_s19   ;;  %s993_s18 = sphi %s1049_s18, %s1245_s18   ;;  %s989_s17 = sphi %s1047_s17, %s1244_s17   ;;  %s985_s16 = sphi %s1045_s16, %s1243_s16   ;;  %s981_s15 = sphi %s1043_s15, %s1242_s15  }
   0x8   : > { %s34_s23 = sadd.s32 1, %s997_s19  ;;  %s116_s24 = sadd.s32 1, %s989_s17 }
   0x9   : > { %p36_p0 = scmp.ge.s32.totalorder %s34_s23, 2  ;;  %p126_p1 = scmp.ne.s32.totalorder %s989_s17, %s985_s16 }
   0xa   : > { %p127_p2 = scmp.eq.s32.totalorder %s752_s21, 1  ;;  %p132_p3 = scmp.ne.s32.totalorder %s985_s16, %s981_s15 }
   0xb   : > { %s1248_s23 = smov (%p36_p0, %s34_s23), 0  ;;  %p133_p5 = scmp.eq.s32.totalorder %s753_s22, 1 }
   0xc   : > { %p1083_p4 = por %p127_p2, %p126_p1  ;;  %s113_s26 = ssub.s32 %s997_s19, %s1248_s23 }
   0xd   : > { %p754_p6 = scmp.ge.s32.totalorder %s1001_s20, 1  ;;  %p114_p7 = scmp.eq.s32.totalorder %s113_s26, 0 }
   0xe   : > { %p1090_p8 = por %p133_p5, %p132_p3  ;;  %p166_p9 = scmp.lt.s32.totalorder %s1001_s20, 3 }
   0xf   : > { %s1096_s28 = scalar_select %p114_p7, %s989_s17, %s116_s24  }
  0x10   : > { %p1098_p10 = pnand %p754_p6, %p166_p9  ;;  %p1102_p11 = scmp.eq.s32.totalorder %s752_s21, 0 }
  0x11   : > { %s1003_s5 = smov [#allocation2]  }
  0x12   : > { %p789_p12 = pneg %p1098_p10  ;;  %s185_s6 = sshll.u32 %s1003_s5, 4  ;;  %s186_s6 = int_to_ptr.vmem [resolvable:$true] %s185_s6 }
  0x13   : > { %s876_s7 = scalar_lea.vmem %s186_s6, 512  ;;  %p884_p5 = scmp.lt.s32.totalorder %s186_s6, %s186_s6 }
  0x14   : > { %p790_p13 = pnand %p1102_p11, %p789_p12  ;;  %p877_p1 = scmp.ne.s32.totalorder %s186_s6, %s876_s7 }
  0x15   : > { %p885_p6 = scmp.lt.s32.totalorder %s876_s7, %s876_s7 }
  0x16   : > { %p867_p0 = pneg %p790_p13 }
  0x17   : > { %p886_p7 = por %p885_p6, %p884_p5 }
  0x18   : > { %p879_p2 = pnand %p877_p1, %p867_p0 }
  0x1a   : > { %p880_p3 = pneg %p879_p2 }
  0x1c   : > { %p887_p9 = pnand %p886_p7, %p880_p3 }
  0x1e   : > { %890 = shalt.err (!%p887_p9)
}
  0x1f   : > { %s1004_s8 = smov 256   ;;  %s1005_s9 = smov 16  }
  0x20   : > { %792 = dma.hbm_to_vmem [thread:$0]  (!%p790_p13), %s1235_s2, 512, %s186_s6, [#allocation3], %s1004_s8, %s1004_s8, %s1005_s9  }
  0x21   : > { %213 = sbr.rel (%p1098_p10) target bundleno = 839 (0x347), region = 32 }
  0x26   : > { %968 = dma.done.wait (%p1102_p11), [#allocation3], 512  }
  0x27   : > { %970 = vsyncadd (%p1102_p11), [#allocation3], 4294966784  ;;  %p255_p12 = scmp.lt.s32.totalorder %s993_s18, 1  ;;  %v1006_v0 = vmov 0.0   ;;  %vm276_vm0 = vcmask 1043456   ;;  %v264_v3 = vld [vmem:[%s1233_s0] sm:$0xff]  ;;  %v370_v31 = vlaneseq }
  0x28   : > { %345 = vmatprep.mubr.f32.mxu0 %v1006_v0  ;;  %351 = vmatprep.mubr.f32.mxu1 %v1006_v0  ;;  %vm269_vm1 = vcmask 31744   ;;  %v265_v4 = vld [vmem:[%s1233_s0 + $0x8] sm:$0x1]  ;;  %v358_v5 = vld [vmem:[#allocation2] sm:$0xff]  ;;  %s1007_s5 = smov 17   ;;  %s1008_s6 = smov 16  }
  0x29   : > { %s256_s12 = scalar_select %p255_p12, %s993_s18, 1  ;;  %v359_v7 = vld [vmem:[#allocation2 + $0x8] sm:$0xff]  ;;  %v360_v22 = vld [vmem:[#allocation2 + $0x10] sm:$0x1]  ;;  %v361_v27 = vld [vmem:[#allocation2 + $0x18] sm:$0x1] }
  0x2a   : > { %s1009_s7 = smov 15   ;;  %s1010_s8 = smov 1   ;;  %v371_v33 = vand.u32 127, %v370_v31  ;;  %v1015_v0 = vmov 1966171168   ;;  %vm496_vm10 = vcmp.lt.s32.totalorder %v370_v31, 256 }
  0x2b   : > { %s773_s13 = sshll.u32 %s256_s12, 3  ;;  %s1011_s9 = smov 127   ;;  %vm543_vm11 = vcmask 1040384  }
  0x2c   : > { %s263_s22 = scalar_lea.vmem %s1234_s1, %s773_s13  ;;  %s1012_s10 = smov 113   ;;  %vm387_vm2 = vcmp.lt.s32.totalorder %v371_v33, 16  ;;  %vm372_vm3 = vcmp.lt.s32.totalorder %v371_v33, 17  ;;  %vm400_vm4 = vcmp.lt.s32.totalorder %v371_v33, 15  ;;  %vm413_vm5 = vcmp.lt.s32.totalorder %v371_v33, 1 }
  0x2d   : > { %v266_v1 = vld [vmem:[%s263_s22] sm:$0xff]  ;;  %s1013_s11 = smov 112   ;;  %s1014_s12 = smov 111   ;;  %vm432_vm6 = vcmp.lt.s32.totalorder %v371_v33, 127  ;;  %vm445_vm7 = vcmp.lt.s32.totalorder %v371_v33, 113  ;;  %vm458_vm8 = vcmp.lt.s32.totalorder %v371_v33, 112 }
  0x2e   : > { %v268_v2 = vcombine.high %v266_v1, %v266_v1  ;;  %vm467_vm9 = vcmp.lt.s32.totalorder %v371_v33, 111  ;;  %s1153_s13 = sand.u32 1, %s985_s16   ;;  %s774_s26 = sshll.u32 %s993_s18, 5 }
  0x2f   : > { %s760_s14 = sshll.u32 %s1153_s13, 1 }
  0x30   : > { %763 = vmatprep.subr.msk.mxu0 %vm276_vm0, %v268_v2  ;;  %775 = vmatprep.subr.msk.mxu1 %vm276_vm0, %v268_v2  ;;  %s1157_s21 = scalar_lea.vmem [#allocation5], %s760_s14 }
  0x31   : > { %764 = vmatpush1.msk.msra.mxu0 %vm276_vm0, %v266_v1  ;;  %776 = vmatpush1.msk.msra.mxu1 %vm276_vm0, %v266_v1  ;;  %v480_v1 = vunpack.c.l.s4 %v1015_v0 }
  0x32   : > { %765 = vmatmul.mubr.msk.f32.vlgmr.msra.gmra.mxu0 %vm269_vm1, %v264_v3  ;;  %766 = vmatmul.mubr.msk.f32.vlgmr.msra.gmra.mxu1 %vm269_vm1, %v265_v4 }
  0xf2   : > { %v347_v6 = vpop.f32.mrf.mxu0  ;;  %v353_v21 = vpop.f32.mrf.mxu1 }
  0xf3   : > { %v1130_v8 = vmul.f32 %v358_v5, %v347_v6  ;;  %v364_v24 = vmul.f32 %v360_v22, %v353_v21 }
  0xf4   : > { %v349_v9 = vpop.f32.mrf.mxu0  ;;  %v355_v26 = vpop.f32.mrf.mxu1 }
  0xf5   : > { %v1132_v10 = vmul.f32 %v359_v7, %v349_v9  ;;  %366 = vrot.lane.b32.xlu0 %v1130_v8, %s1007_s5  ;;  %v379_v11 = vrot.slane %v1130_v8, 1  ;;  %v392_v13 = vrot.slane %v1130_v8, 2  ;;  %v405_v15 = vrot.slane %v1130_v8, 3 }
  0xf6   : > { %v424_v17 = vrot.slane %v1130_v8, 5  ;;  %v437_v19 = vrot.slane %v1130_v8, 6  ;;  %v450_v23 = vrot.slane %v1130_v8, 7  ;;  %v365_v28 = vmul.f32 %v361_v27, %v355_v26 }
  0xf7   : > { %383 = vrot.lane.b32.xlu1 %v379_v11, %s1008_s6  ;;  %v380_v12 = vrot.slane %v1132_v10, 1  ;;  %v393_v14 = vrot.slane %v1132_v10, 2  ;;  %v406_v16 = vrot.slane %v1132_v10, 3  ;;  %v425_v18 = vrot.slane %v1132_v10, 5 }
  0xf8   : > { %v438_v20 = vrot.slane %v1132_v10, 6  ;;  %v451_v25 = vrot.slane %v1132_v10, 7  ;;  %v418_v55 = vrot.slane %v1130_v8, 4  ;;  %v419_v56 = vrot.slane %v1132_v10, 4 }
  0xf9   : > { %368 = vrot.lane.b32.xlu0 %v1132_v10, %s1007_s5  ;;  %v481_v11 = vunpack.c.0.s8 %v480_v1  ;;  %s606_s5 = scalar_lea.hbm %s1236_s3, %s774_s26 }
  0xfb   : > { %385 = vrot.lane.b32.xlu1 %v380_v12, %s1008_s6  ;;  %v483_v12 = vshrl.u32 %v370_v31, 7  ;;  %s608_s6 = sshll.u32 %s1157_s21, 4  ;;  %s609_s6 = int_to_ptr.vmem [resolvable:$true] %s608_s6 }
  0xfd   : > { %396 = vrot.lane.b32.xlu0 %v392_v13, %s1009_s7  ;;  %v539_v26 = vsub.s32 1, %v483_v12 }
  0xff   : > { %398 = vrot.lane.b32.xlu1 %v393_v14, %s1009_s7  ;;  %s590_s7 = scalar_lea.sflag [#allocation4], %s1153_s13 }
 0x101   : > { %409 = vrot.lane.b32.xlu0 %v405_v15, %s1010_s8 }
 0x103   : > { %411 = vrot.lane.b32.xlu1 %v406_v16, %s1010_s8  ;;  %s891_s8 = scalar_lea.vmem %s609_s6, 32 }
 0x104   : > { %p892_p10 = scmp.ne.s32.totalorder %s609_s6, %s891_s8 }
 0x105   : > { %428 = vrot.lane.b32.xlu0 %v424_v17, %s1011_s9 }
 0x106   : > { %p893_p11 = pnand %p892_p10, %p1083_p4 }
 0x107   : > { %430 = vrot.lane.b32.xlu1 %v425_v18, %s1011_s9  ;;  %s1016_s9 = smov [#allocation5]  }
 0x108   : > { %p894_p13 = pneg %p893_p11 }
 0x109   : > { %441 = vrot.lane.b32.xlu0 %v437_v19, %s1012_s10  ;;  %v484_v19 = vsub.s32 %v481_v11, %v483_v12 }
 0x10b   : > { %443 = vrot.lane.b32.xlu1 %v438_v20, %s1012_s10  ;;  %s895_s10 = sshll.u32 %s1016_s9, 4  ;;  %s896_s10 = int_to_ptr.vmem [resolvable:$false] %s895_s10 }
 0x10c   : > { %p898_p0 = scmp.lt.s32.totalorder %s609_s6, %s896_s10 }
 0x10d   : > { %454 = vrot.lane.b32.xlu0 %v450_v23, %s1013_s11 }
 0x10f   : > { %456 = vrot.lane.b32.xlu1 %v451_v25, %s1013_s11  ;;  %v535_v25 = vsub.s32 0, %v483_v12  ;;  %s897_s11 = scalar_lea.vmem %s896_s10, 64 }
 0x110   : > { %p899_p1 = scmp.lt.s32.totalorder %s897_s11, %s891_s8 }
 0x111   : > { %463 = vrot.lane.b32.xlu0 %v364_v24, %s1014_s12 }
 0x112   : > { %p900_p2 = por %p899_p1, %p898_p0 }
 0x113   : > { %465 = vrot.lane.b32.xlu1 %v365_v28, %s1014_s12 }
 0x114   : > { %p901_p3 = pnand %p900_p2, %p894_p13 }
 0x167   : > { %v367_v29 = vpop.permute.xlu0 %366 }
 0x169   : > { %v384_v30 = vpop.permute.xlu1 %383 }
 0x16b   : > { %v369_v32 = vpop.permute.xlu0 %368 }
 0x16c   : > { %v373_v40 = vsel %vm372_vm3, %v367_v29, %v369_v32  ;;  %v374_v41 = vsel %vm372_vm3, %v369_v32, %v367_v29 }
 0x16d   : > { %v386_v34 = vpop.permute.xlu1 %385 }
 0x16e   : > { %v388_v37 = vsel %vm387_vm2, %v384_v30, %v386_v34  ;;  %v389_v38 = vsel %vm387_vm2, %v386_v34, %v384_v30 }
 0x16f   : > { %v397_v35 = vpop.permute.xlu0 %396  ;;  %v390_v44 = vadd.f32 %v389_v38, %v374_v41  ;;  %v391_v45 = vadd.f32 %v388_v37, %v373_v40 }
 0x171   : > { %v399_v36 = vpop.permute.xlu1 %398 }
 0x172   : > { %v401_v42 = vsel %vm400_vm4, %v397_v35, %v399_v36  ;;  %v402_v43 = vsel %vm400_vm4, %v399_v36, %v397_v35 }
 0x173   : > { %v410_v39 = vpop.permute.xlu0 %409  ;;  %v403_v49 = vadd.f32 %v402_v43, %v390_v44  ;;  %v404_v50 = vadd.f32 %v401_v42, %v391_v45 }
 0x175   : > { %v412_v46 = vpop.permute.xlu1 %411 }
 0x176   : > { %v414_v47 = vsel %vm413_vm5, %v410_v39, %v412_v46  ;;  %v415_v48 = vsel %vm413_vm5, %v412_v46, %v410_v39 }
 0x177   : > { %v429_v51 = vpop.permute.xlu0 %428  ;;  %v416_v52 = vadd.f32 %v415_v48, %v403_v49  ;;  %v417_v53 = vadd.f32 %v414_v47, %v404_v50 }
 0x179   : > { %v431_v54 = vpop.permute.xlu1 %430  ;;  %v422_v58 = vadd.f32 %v418_v55, %v416_v52  ;;  %v423_v59 = vadd.f32 %v419_v56, %v417_v53 }
 0x17a   : > { %v433_v61 = vsel %vm432_vm6, %v429_v51, %v431_v54  ;;  %v434_v62 = vsel %vm432_vm6, %v431_v54, %v429_v51 }
 0x17b   : > { %v442_v57 = vpop.permute.xlu0 %441  ;;  %v435_v4 = vadd.f32 %v433_v61, %v422_v58  ;;  %v436_v5 = vadd.f32 %v434_v62, %v423_v59 }
 0x17d   : > { %v444_v60 = vpop.permute.xlu1 %443 }
 0x17e   : > { %v446_v2 = vsel %vm445_vm7, %v442_v57, %v444_v60  ;;  %v447_v3 = vsel %vm445_vm7, %v444_v60, %v442_v57 }
 0x17f   : > { %v455_v63 = vpop.permute.xlu0 %454  ;;  %v448_v9 = vadd.f32 %v446_v2, %v435_v4  ;;  %v449_v10 = vadd.f32 %v447_v3, %v436_v5 }
 0x181   : > { %v457_v6 = vpop.permute.xlu1 %456 }
 0x182   : > { %v459_v7 = vsel %vm458_vm8, %v455_v63, %v457_v6  ;;  %v460_v8 = vsel %vm458_vm8, %v457_v6, %v455_v63 }
 0x183   : > { %v461_v13 = vadd.f32 %v459_v7, %v448_v9  ;;  %v462_v14 = vadd.f32 %v460_v8, %v449_v10  ;;  %v464_v15 = vpop.permute.xlu0 %463 }
 0x185   : > { %v466_v16 = vpop.permute.xlu1 %465 }
 0x186   : > { %v468_v17 = vsel %vm467_vm9, %v464_v15, %v466_v16  ;;  %v469_v18 = vsel %vm467_vm9, %v466_v16, %v464_v15 }
 0x187   : > { %v470_v20 = vadd.f32 %v468_v17, %v461_v13  ;;  %v471_v21 = vadd.f32 %v469_v18, %v462_v14 }
 0x189   : > { %v478_v22 = vcombine.low %v470_v20, %v471_v21 }
 0x18b   : > { %v485_v23 = vrot.slane %v478_v22, %v484_v19 }
 0x18d   : > { %v492_v24 = vrot.slane %v485_v23, %v484_v19 }
 0x18f   : > { %498 = vst.msk [vmem:[%s1157_s21] sm:$0x3] %vm496_vm10, %v492_v24 }
 0x196   : > { %v531_v27 = vld [vmem:[%s1157_s21] sm:$0x3] }
 0x197   : > { %v536_v28 = vrot.slane %v531_v27, %v535_v25  ;;  %v540_v29 = vrot.slane %v531_v27, %v539_v26 }
 0x199   : > { %v544_v30 = vsel %vm543_vm11, %v536_v28, 0.0  ;;  %v545_v32 = vsel %vm543_vm11, %v540_v29, 0.0 }
 0x19a   : > { %v546_v33 = vadd.f32 %v545_v32, %v544_v30 }
 0x19c   : > { %547 = vadd.xlane.f32.xlu0 %v546_v33 }
 0x225   : > { %v548_v34 = vpop.xlane.xlu0 %547 }
 0x226   : > { %v549_v31 = vrot.slane %v548_v34, 4 }
 0x228   : > { %v550_v35 = vadd.f32 %v549_v31, %v548_v34 }
 0x22a   : > { %v551_v36 = vrot.slane %v550_v35, 2 }
 0x22c   : > { %v552_v37 = vadd.f32 %v551_v36, %v550_v35 }
 0x22e   : > { %v553_v38 = vrot.slane %v552_v37, 1 }
 0x230   : > { %v554_v39 = vadd.f32 %v553_v38, %v552_v37 }
 0x232   : > { %777 = vpush %v554_v39 }
 0x263   : > { %s1163_s22 = spop %777 }
 0x264   : > { %s556_s24 = smul.f32 0.00390625, %s1163_s22 }
 0x266   : > { %v557_v40 = vstv %s556_s24 }
 0x267   : > { %v558_v41 = vsub.f32 %v531_v27, %v557_v40 }
 0x269   : > { %v559_v42 = vmul.f32 %v558_v41, %v558_v41 }
 0x26b   : > { %v564_v43 = vrot.slane %v559_v42, %v535_v25  ;;  %v568_v44 = vrot.slane %v559_v42, %v539_v26 }
 0x26d   : > { %v571_v45 = vsel %vm543_vm11, %v564_v43, 0.0  ;;  %v572_v46 = vsel %vm543_vm11, %v568_v44, 0.0 }
 0x26e   : > { %v573_v47 = vadd.f32 %v572_v46, %v571_v45 }
 0x270   : > { %574 = vadd.xlane.f32.xlu1 %v573_v47 }
 0x271   : > { %904 = shalt.err (!%p901_p3)
}
 0x272   : > { %s905_s12 = scalar_lea.hbm %s606_s5, 32  ;;  %s909_s24 = scalar_lea.hbm %s1236_s3, 64 }
 0x273   : > { %p906_p5 = scmp.ne.s32.totalorder %s606_s5, %s905_s12  ;;  %p910_p9 = scmp.lt.s32.totalorder %s606_s5, %s1236_s3 }
 0x274   : > { %p911_p12 = scmp.lt.s32.totalorder %s909_s24, %s905_s12 }
 0x275   : > { %p907_p6 = pnand %p906_p5, %p1083_p4 }
 0x276   : > { %p912_p10 = por %p911_p12, %p910_p9 }
 0x277   : > { %p908_p7 = pneg %p907_p6 }
 0x279   : > { %p913_p11 = pnand %p912_p10, %p908_p7 }
 0x27b   : > { %916 = shalt.err (!%p913_p11)
}
 0x27c   : > { %785 = dma.vmem_to_hbm [thread:$0]  (%p1083_p4), %s609_s6, 32, %s606_s5, %s590_s7   ;;  %vm585_vm12 = vcmask 7168   ;;  %vm587_vm13 = vcmask 8192   ;;  %v583_v55 = vstv %s1163_s22 }
 0x27d   : > { %s770_s30 = sshll.u32 %s993_s18, 4  ;;  %s250_s8 = scalar_lea.vmem [#allocation6], %s1153_s13 }
 0x27e   : > { %s621_s9 = sshll.u32 %s250_s8, 4  ;;  %s1192_s6 = scalar_lea.hbm %s1237_s4, %s770_s30  ;;  %s622_s9 = int_to_ptr.vmem [resolvable:$true] %s621_s9 }
 0x27f   : > { %s595_s7 = scalar_lea.sflag [#allocation7], %s1153_s13  ;;  %s917_s12 = scalar_lea.vmem %s622_s9, 16 }
 0x280   : > { %p918_p13 = scmp.ne.s32.totalorder %s622_s9, %s917_s12  ;;  %s1017_s18 = smov [#allocation6]  }
 0x281   : > { %s921_s14 = sshll.u32 %s1017_s18, 4  ;;  %s922_s14 = int_to_ptr.vmem [resolvable:$false] %s921_s14 }
 0x282   : > { %p919_p0 = pnand %p918_p13, %p1083_p4  ;;  %s923_s21 = scalar_lea.vmem %s922_s14, 32 }
 0x283   : > { %p924_p2 = scmp.lt.s32.totalorder %s622_s9, %s922_s14  ;;  %p925_p3 = scmp.lt.s32.totalorder %s923_s21, %s917_s12 }
 0x284   : > { %p920_p1 = pneg %p919_p0 }
 0x285   : > { %p926_p5 = por %p925_p3, %p924_p2 }
 0x287   : > { %p927_p6 = pnand %p926_p5, %p920_p1 }
 0x2f9   : > { %v575_v48 = vpop.xlane.xlu1 %574 }
 0x2fa   : > { %v576_v49 = vrot.slane %v575_v48, 4 }
 0x2fc   : > { %v577_v50 = vadd.f32 %v576_v49, %v575_v48 }
 0x2fe   : > { %v578_v51 = vrot.slane %v577_v50, 2 }
 0x300   : > { %v579_v52 = vadd.f32 %v578_v51, %v577_v50 }
 0x302   : > { %v580_v53 = vrot.slane %v579_v52, 1 }
 0x304   : > { %v581_v54 = vadd.f32 %v580_v53, %v579_v52 }
 0x306   : > { %779 = vpush %v581_v54 }
 0x337   : > { %s780_s10 = spop %779 }
 0x338   : > { %v584_v56 = vstv %s780_s10 }
 0x339   : > { %v586_v57 = vsel %vm585_vm12, %v583_v55, %v584_v56 }
 0x33a   : > { %588 = vst.msk [vmem:[%s250_s8] sm:$0x1] %vm587_vm13, %v586_v57 }
 0x33b   : > { %930 = shalt.err (!%p927_p6)
}
 0x33c   : > { %s931_s22 = scalar_lea.hbm %s1192_s6, 16  ;;  %s935_s26 = scalar_lea.hbm %s1237_s4, 32 }
 0x33d   : > { %p932_p7 = scmp.ne.s32.totalorder %s1192_s6, %s931_s22  ;;  %p936_p10 = scmp.lt.s32.totalorder %s1192_s6, %s1237_s4 }
 0x33e   : > { %p937_p11 = scmp.lt.s32.totalorder %s935_s26, %s931_s22 }
 0x33f   : > { %p933_p9 = pnand %p932_p7, %p1083_p4 }
 0x340   : > { %p938_p13 = por %p937_p11, %p936_p10 }
 0x341   : > { %p934_p12 = pneg %p933_p9 }
 0x343   : > { %p939_p0 = pnand %p938_p13, %p934_p12 }
 0x345   : > { %942 = shalt.err (!%p939_p0)
}
 0x346   : > { %786 = dma.vmem_to_hbm [thread:$0]  (%p1083_p4), %s622_s9, 16, %s1192_s6, %s595_s7  }
 0x347 PF: > { %p802_p1 = scmp.ge.s32.totalorder %s1001_s20, 2  ;;  %s633_s8 = sand.u32 1, %s981_s15  }
 0x348   : > { %s634_s10 = scalar_lea.sflag [#allocation4], %s633_s8 }
 0x349   : > { %p794_p2 = pnand %p802_p1, %p1090_p8 }
 0x34b   : > { %p795_p3 = pneg %p794_p2 }
 0x34d   : > { %972 = dma.done.wait (%p795_p3), %s634_s10, 32  }
 0x34e   : > { %974 = vsyncadd (%p795_p3), %s634_s10, 4294967264  ;;  %s643_s11 = scalar_lea.sflag [#allocation7], %s633_s8 }
 0x34f   : > { %976 = dma.done.wait (%p795_p3), %s643_s11, 16  }
 0x350   : > { %978 = vsyncadd (%p795_p3), %s643_s11, 4294967280  ;;  %s22_s20 = sadd.s32 1, %s1001_s20   ;;  %s1242_s15 = smov %s985_s16 }
 0x351   : > { %p19_p5 = scmp.ge.s32.totalorder %s22_s20, 4   ;;  %s1243_s16 = smov %s989_s17 }
 0x352   : > { %s1244_s17 = smov %s1096_s28  ;;  %s1245_s18 = smov %s997_s19 }
 0x353   : > { %s1246_s19 = smov %s1248_s23  ;;  %21 = sbr.rel (!%p19_p5) target bundleno = 7 (0x7), region = 104 }
 0x358   :  { %647 = vsyncpa [#allocation3], 1 }
 0x359   :  { %649 = vsyncpa [#allocation3 + $0x1], 1 }
 0x35a   :  { %650 = vsyncpa [#allocation4], 1 }
 0x35b   :  { %652 = vsyncpa [#allocation4 + $0x1], 1 }
 0x35c   :  { %653 = vsyncpa [#allocation7], 1 }
 0x35d   :  { %655 = vsyncpa [#allocation7 + $0x1], 1 }

</bundles_post_ra>
